<compile_context>
chip_gen: v7x
topology: tpu7x:2x2x1
jax: 0.10.0
libtpu: 0.0.40
codegen_flags: <defaults>
</compile_context>

<pallas_src>
from functools import partial

import numpy as np
import jax
import jax.numpy as jnp
from jax.experimental import pallas as pl
from jax.experimental.pallas import tpu as pltpu

# ~4 MiB per (C, TR, L) block: in + out, double-buffered => ~16 MiB VMEM.
_TARGET_BLOCK_BYTES = 4 << 20


def _round_up(x, m):
    return ((x + m - 1) // m) * m


def _normalize_kernel(mean_ref, scale_ref, x_ref, o_ref):
    # mean_ref / scale_ref: (C,) float32 in SMEM; x_ref / o_ref: (C, TR, L) VMEM.
    C = x_ref.shape[0]
    for c in range(C):          # C is tiny (1-4): fully unrolled at trace time.
        m = mean_ref[c]
        s = scale_ref[c]
        xf = x_ref[c].astype(jnp.float32)
        o_ref[c] = ((xf - m) * s).astype(o_ref.dtype)


def _normalize_core(x, mean_arr, scale_arr):
    """x: (C, H, W). mean_arr / scale_arr: (C,) float32 device arrays."""
    C, H, W = x.shape
    N = H * W
    itemsize = jnp.dtype(x.dtype).itemsize
    # Packed sublane tile: 8 rows for f32, 16 for bf16, 32 for int8/fp8.
    sub = max(8, 32 // itemsize)

    # Prefer a lane-dense flattened layout (C, R, L) with L a multiple of 128.
    L = None
    for cand in (4096, 2048, 1024, 512, 256, 128):
        if N % cand == 0:
            L = cand
            break
    if L is not None:
        R = N // L
        x3 = x.reshape(C, R, L)
    else:
        # Fallback: tile over image rows; W is the (full-extent) lane dim.
        R, L = H, W
        x3 = x

    # Row-tile size from the lane-PADDED footprint (VMEM pads lanes to 128).
    padded_L = _round_up(L, 128)
    row_bytes = C * padded_L * itemsize
    cap = max(sub, _TARGET_BLOCK_BYTES // row_bytes)
    if R <= cap:
        TR = R                              # full extent (always a legal block)
    else:
        TR = max(sub, (cap // sub) * sub)   # multiple of the packed sublane tile

    num_tiles = pl.cdiv(R, TR)
    # v7x megacore: if everything fits one tile but there are enough rows,
    # split into two tiles so both TensorCores get work.
    if num_tiles == 1 and R >= 2 * sub:
        TR = _round_up(pl.cdiv(R, 2), sub)
        num_tiles = pl.cdiv(R, TR)

    grid = (num_tiles,)

    padded_TR = _round_up(TR, sub)
    block_bytes = C * padded_TR * padded_L * itemsize
    # in + out, double-buffered => 4x block; add headroom. Explicit limit so the
    # pipeline also compiles under v5e's 16 MiB default scoped VMEM limit.
    vmem_limit = max(32 << 20, 4 * block_bytes + (4 << 20))

    cost = pl.CostEstimate(
        flops=2 * C * N,
        transcendentals=0,
        bytes_accessed=2 * C * N * itemsize + 2 * C * 4,
    )

    out3 = pl.pallas_call(
        _normalize_kernel,
        out_shape=jax.ShapeDtypeStruct(x3.shape, x.dtype),
        grid=grid,
        in_specs=[
            pl.BlockSpec(memory_space=pltpu.MemorySpace.SMEM),   # mean (C,)
            pl.BlockSpec(memory_space=pltpu.MemorySpace.SMEM),   # scale (C,)
            pl.BlockSpec((C, TR, L), lambda r: (0, r, 0)),       # x tile
        ],
        out_specs=pl.BlockSpec((C, TR, L), lambda r: (0, r, 0)),
        compiler_params=pltpu.CompilerParams(
            dimension_semantics=("parallel",),
            vmem_limit_bytes=vmem_limit),
        cost_estimate=cost,
    )(mean_arr, scale_arr, x3)

    return out3.reshape(C, H, W)


_normalize_jit = jax.jit(_normalize_core)


@jax.jit
def _normalize_list_jit(xs, means, scales):
    # One dispatch for the whole list (amortizes launch overhead), no stacking
    # copies; each element keeps its own per-channel parameters.
    return tuple(_normalize_core(x, m, s) for x, m, s in zip(xs, means, scales))


def _as_channel_params(value, C):
    """Accept python scalar, list/tuple, or np/jnp array; return (C,) float32."""
    arr = np.asarray(value, dtype=np.float32)
    if arr.ndim == 0 or arr.size == 1:
        arr = np.full((C,), float(arr.reshape(-1)[0]), dtype=np.float32)
    arr = arr.reshape(-1)
    assert arr.shape[0] == C, (
        'mean and scale must be broadcastable to the input shape: '
        'C={} vs {}'.format(C, value))
    return arr


class NormalizeMeanScale:
    """JAX/Pallas port of the PyTorch NormalizeMeanScale transform.

    Note: JAX arrays are immutable, so this returns new arrays instead of
    mutating in place like the PyTorch module (values are identical).
    """

    def __init__(self, mean, scale):
        self.mean = mean
        self.scale = scale
        self._param_cache = {}   # C -> (mean_dev, scale_dev), avoids per-call upload

    def _params(self, C):
        cached = self._param_cache.get(C)
        if cached is None:
            m = jnp.asarray(_as_channel_params(self.mean, C))
            s = jnp.asarray(_as_channel_params(self.scale, C))
            cached = (m, s)
            self._param_cache[C] = cached
        return cached

    def __call__(self, tensor):
        if isinstance(tensor, (list, tuple)):
            if len(tensor) == 0:
                return []
            params = [self._params(t.shape[0]) for t in tensor]
            means = tuple(p[0] for p in params)
            scales = tuple(p[1] for p in params)
            outs = _normalize_list_jit(tuple(tensor), means, scales)
            return list(outs)
        m, s = self._params(tensor.shape[0])
        return _normalize_jit(tensor, m, s)

    def __repr__(self):
        return self.__class__.__name__ + '(mean={0}, scale={1})'.format(
            self.mean, self.scale)


if __name__ == "__main__":
    key = jax.random.PRNGKey(0)
    k1, k2, k3 = jax.random.split(key, 3)

    # --- Case 1: (C, H, W) with per-channel mean/scale lists (lane-dense path,
    #             single (C, R, L) tile).
    C, H, W = 4, 16, 16
    mean = [0.485, 0.456, 0.406, 0.5]
    scale = [1.0 / 0.229, 1.0 / 0.224, 1.0 / 0.225, 2.0]
    x = jax.random.normal(k1, (C, H, W), dtype=jnp.float32)

    norm = NormalizeMeanScale(mean, scale)
    out = jax.block_until_ready(norm(x))
    ref = (x - jnp.asarray(mean, jnp.float32)[:, None, None]) \
          * jnp.asarray(scale, jnp.float32)[:, None, None]
    assert out.shape == x.shape and out.dtype == x.dtype
    assert jnp.allclose(out, ref, atol=1e-5, rtol=1e-5)

    # --- Case 2: bf16 input (params stay f32 in SMEM, math in f32).
    xb = x.astype(jnp.bfloat16)
    outb = jax.block_until_ready(norm(xb))
    refb = ((xb.astype(jnp.float32) - jnp.asarray(mean, jnp.float32)[:, None, None])
            * jnp.asarray(scale, jnp.float32)[:, None, None]).astype(jnp.bfloat16)
    assert outb.dtype == jnp.bfloat16
    assert jnp.allclose(outb.astype(jnp.float32), refb.astype(jnp.float32),
                        atol=2e-2, rtol=2e-2)

    # --- Case 3: list input + scalar mean/scale broadcasting (single dispatch).
    x2 = jax.random.normal(k2, (C, H, W), dtype=jnp.float32)
    norm_scalar = NormalizeMeanScale(0.5, 2.0)
    outs = jax.block_until_ready(norm_scalar([x, x2]))
    assert jnp.allclose(outs[0], (x - 0.5) * 2.0, atol=1e-5, rtol=1e-5)
    assert jnp.allclose(outs[1], (x2 - 0.5) * 2.0, atol=1e-5, rtol=1e-5)

    # --- Case 4: spatial size not a multiple of 128 (row-tiled fallback),
    #             array-valued mean/scale (shape (C,)), and a partial last
    #             row-tile (guards Pallas' automatic edge masking).
    C3, H3, W3 = 3, 40, 52
    x3 = jax.random.normal(k3, (C3, H3, W3), dtype=jnp.float32)
    mean3 = np.array([0.1, 0.2, 0.3], dtype=np.float32)
    scale3 = np.array([2.0, 3.0, 4.0], dtype=np.float32)
    norm3 = NormalizeMeanScale(mean3, scale3)
    out3 = jax.block_until_ready(norm3(x3))
    ref3 = (x3 - jnp.asarray(mean3)[:, None, None]) \
           * jnp.asarray(scale3)[:, None, None]
    assert jnp.allclose(out3, ref3, atol=1e-5, rtol=1e-5)

    print("KERNEL_OK")
</pallas_src>

<mosaic_0001>
module attributes {stable_mosaic.version = 11 : i64} {
  func.func @_normalize_kernel(%arg0: i32, %arg1: memref<4xf32, #tpu.memory_space<smem>>, %arg2: memref<4xf32, #tpu.memory_space<smem>>, %arg3: memref<4x1x256xf32, #tpu.memory_space<vmem>>, %arg4: memref<4x1x256xf32, #tpu.memory_space<vmem>>) attributes {dimension_semantics = [#tpu.dimension_semantics<parallel>], iteration_bounds = array<i64: 1>, scalar_prefetch = 0 : i64, scratch_operands = 0 : i64, tpu.core_type = #tpu.core_type<tc>, window_params = [{transform_indices = @transform_0, window_bounds = array<i64: 4>}, {transform_indices = @transform_1, window_bounds = array<i64: 4>}, {transform_indices = @transform_2, window_bounds = array<i64: 4, 1, 256>}, {transform_indices = @transform_3, window_bounds = array<i64: 4, 1, 256>}]} {
    %c0 = arith.constant 0 : index
    %0 = memref.load %arg1[%c0] : memref<4xf32, #tpu.memory_space<smem>>
    %c0_0 = arith.constant 0 : index
    %1 = memref.load %arg2[%c0_0] : memref<4xf32, #tpu.memory_space<smem>>
    %c0_1 = arith.constant 0 : index
    %c0_2 = arith.constant 0 : index
    %c0_3 = arith.constant 0 : index
    %2 = vector.load %arg3[%c0_1, %c0_2, %c0_3] : memref<4x1x256xf32, #tpu.memory_space<vmem>>, vector<1x1x256xf32>
    %3 = vector.shape_cast %2 : vector<1x1x256xf32> to vector<1x256xf32>
    %4 = vector.broadcast %0 : f32 to vector<1x256xf32>
    %5 = arith.subf %3, %4 : vector<1x256xf32>
    %6 = vector.broadcast %1 : f32 to vector<1x256xf32>
    %7 = arith.mulf %5, %6 : vector<1x256xf32>
    %c0_4 = arith.constant 0 : index
    %c0_5 = arith.constant 0 : index
    %c0_6 = arith.constant 0 : index
    %8 = vector.load %arg4[%c0_4, %c0_5, %c0_6] : memref<4x1x256xf32, #tpu.memory_space<vmem>>, vector<1x1x256xf32>
    %9 = vector.shape_cast %8 : vector<1x1x256xf32> to vector<1x256xf32>
    %10 = vector.shape_cast %7 : vector<1x256xf32> to vector<1x1x256xf32>
    tpu.vector_store %arg4[%c0_4, %c0_5, %c0_6], %10 {strides = array<i32>} : memref<4x1x256xf32, #tpu.memory_space<vmem>>, vector<1x1x256xf32>,
    %c1 = arith.constant 1 : index
    %11 = memref.load %arg1[%c1] : memref<4xf32, #tpu.memory_space<smem>>
    %c1_7 = arith.constant 1 : index
    %12 = memref.load %arg2[%c1_7] : memref<4xf32, #tpu.memory_space<smem>>
    %c1_8 = arith.constant 1 : index
    %c0_9 = arith.constant 0 : index
    %c0_10 = arith.constant 0 : index
    %13 = vector.load %arg3[%c1_8, %c0_9, %c0_10] : memref<4x1x256xf32, #tpu.memory_space<vmem>>, vector<1x1x256xf32>
    %14 = vector.shape_cast %13 : vector<1x1x256xf32> to vector<1x256xf32>
    %15 = vector.broadcast %11 : f32 to vector<1x256xf32>
    %16 = arith.subf %14, %15 : vector<1x256xf32>
    %17 = vector.broadcast %12 : f32 to vector<1x256xf32>
    %18 = arith.mulf %16, %17 : vector<1x256xf32>
    %c1_11 = arith.constant 1 : index
    %c0_12 = arith.constant 0 : index
    %c0_13 = arith.constant 0 : index
    %19 = vector.load %arg4[%c1_11, %c0_12, %c0_13] : memref<4x1x256xf32, #tpu.memory_space<vmem>>, vector<1x1x256xf32>
    %20 = vector.shape_cast %19 : vector<1x1x256xf32> to vector<1x256xf32>
    %21 = vector.shape_cast %18 : vector<1x256xf32> to vector<1x1x256xf32>
    tpu.vector_store %arg4[%c1_11, %c0_12, %c0_13], %21 {strides = array<i32>} : memref<4x1x256xf32, #tpu.memory_space<vmem>>, vector<1x1x256xf32>,
    %c2 = arith.constant 2 : index
    %22 = memref.load %arg1[%c2] : memref<4xf32, #tpu.memory_space<smem>>
    %c2_14 = arith.constant 2 : index
    %23 = memref.load %arg2[%c2_14] : memref<4xf32, #tpu.memory_space<smem>>
    %c2_15 = arith.constant 2 : index
    %c0_16 = arith.constant 0 : index
    %c0_17 = arith.constant 0 : index
    %24 = vector.load %arg3[%c2_15, %c0_16, %c0_17] : memref<4x1x256xf32, #tpu.memory_space<vmem>>, vector<1x1x256xf32>
    %25 = vector.shape_cast %24 : vector<1x1x256xf32> to vector<1x256xf32>
    %26 = vector.broadcast %22 : f32 to vector<1x256xf32>
    %27 = arith.subf %25, %26 : vector<1x256xf32>
    %28 = vector.broadcast %23 : f32 to vector<1x256xf32>
    %29 = arith.mulf %27, %28 : vector<1x256xf32>
    %c2_18 = arith.constant 2 : index
    %c0_19 = arith.constant 0 : index
    %c0_20 = arith.constant 0 : index
    %30 = vector.load %arg4[%c2_18, %c0_19, %c0_20] : memref<4x1x256xf32, #tpu.memory_space<vmem>>, vector<1x1x256xf32>
    %31 = vector.shape_cast %30 : vector<1x1x256xf32> to vector<1x256xf32>
    %32 = vector.shape_cast %29 : vector<1x256xf32> to vector<1x1x256xf32>
    tpu.vector_store %arg4[%c2_18, %c0_19, %c0_20], %32 {strides = array<i32>} : memref<4x1x256xf32, #tpu.memory_space<vmem>>, vector<1x1x256xf32>,
    %c3 = arith.constant 3 : index
    %33 = memref.load %arg1[%c3] : memref<4xf32, #tpu.memory_space<smem>>
    %c3_21 = arith.constant 3 : index
    %34 = memref.load %arg2[%c3_21] : memref<4xf32, #tpu.memory_space<smem>>
    %c3_22 = arith.constant 3 : index
    %c0_23 = arith.constant 0 : index
    %c0_24 = arith.constant 0 : index
    %35 = vector.load %arg3[%c3_22, %c0_23, %c0_24] : memref<4x1x256xf32, #tpu.memory_space<vmem>>, vector<1x1x256xf32>
    %36 = vector.shape_cast %35 : vector<1x1x256xf32> to vector<1x256xf32>
    %37 = vector.broadcast %33 : f32 to vector<1x256xf32>
    %38 = arith.subf %36, %37 : vector<1x256xf32>
    %39 = vector.broadcast %34 : f32 to vector<1x256xf32>
    %40 = arith.mulf %38, %39 : vector<1x256xf32>
    %c3_25 = arith.constant 3 : index
    %c0_26 = arith.constant 0 : index
    %c0_27 = arith.constant 0 : index
    %41 = vector.load %arg4[%c3_25, %c0_26, %c0_27] : memref<4x1x256xf32, #tpu.memory_space<vmem>>, vector<1x1x256xf32>
    %42 = vector.shape_cast %41 : vector<1x1x256xf32> to vector<1x256xf32>
    %43 = vector.shape_cast %40 : vector<1x256xf32> to vector<1x1x256xf32>
    tpu.vector_store %arg4[%c3_25, %c0_26, %c0_27], %43 {strides = array<i32>} : memref<4x1x256xf32, #tpu.memory_space<vmem>>, vector<1x1x256xf32>,
    return
  }
  func.func @transform_0(%arg0: i32) -> i32 {
    %c0_i32 = arith.constant 0 : i32
    %c0_i32_0 = arith.constant 0 : i32
    return %c0_i32 : i32
  }
  func.func @transform_1(%arg0: i32) -> i32 {
    %c0_i32 = arith.constant 0 : i32
    %c0_i32_0 = arith.constant 0 : i32
    return %c0_i32 : i32
  }
  func.func @transform_2(%arg0: i32) -> (i32, i32, i32) {
    %c0_i32 = arith.constant 0 : i32
    %c0_i32_0 = arith.constant 0 : i32
    %c0_i32_1 = arith.constant 0 : i32
    return %c0_i32, %arg0, %c0_i32_0 : i32, i32, i32
  }
  func.func @transform_3(%arg0: i32) -> (i32, i32, i32) {
    %c0_i32 = arith.constant 0 : i32
    %c0_i32_0 = arith.constant 0 : i32
    %c0_i32_1 = arith.constant 0 : i32
    return %c0_i32, %arg0, %c0_i32_0 : i32, i32, i32
  }
}

</mosaic_0001>

<bundles_post_ra>
// kernel: _normalize_core.1
= control target key start
LH: loop header
LB: loop body
LE: loop exit
PB: predicated region body
PF: predicated region fallthrough
CT: control target
= control target key end

     0   :  { %8 = vsyncpa [#allocation3], 0  ;;  %s181_s0 = inlined_call_operand.vmem [shape: f32[4], index: 0, kind: input, shape index: {}]   ;;  %s182_s1 = inlined_call_operand.vmem [shape: f32[4], index: 1, kind: input, shape index: {}]   ;;  %s183_s2 = inlined_call_operand.vmem [shape: f32[4,1,256], index: 2, kind: input, shape index: {}]   ;;  %s184_s3 = inlined_call_operand.vmem [shape: f32[4,1,256], index: 3, kind: output, shape index: {}]  }
   0x1   :  { %s16_s14 = sshll.u32 %s181_s0, 4  ;;  %s17_s14 = int_to_ptr.vmem [resolvable:$true] %s16_s14 }
   0x2   :  { %9 = vsyncpa [#allocation5], 0  ;;  %s26_s17 = sshll.u32 %s182_s1, 4  ;;  %s101_s18 = scalar_lea.vmem %s17_s14, 16  ;;  %s27_s17 = int_to_ptr.vmem [resolvable:$true] %s26_s17 }
   0x3   :  { %p102_p0 = scmp.ne.s32.totalorder %s17_s14, %s101_s18  ;;  %p106_p1 = scmp.lt.s32.totalorder %s17_s14, %s17_s14 }
   0x4   :  { %p107_p2 = scmp.lt.s32.totalorder %s101_s18, %s101_s18 }
   0x6   :  { %p108_p3 = por %p107_p2, %p106_p1 }
   0x8   :  { %p109_p4 = pnand %p108_p3, %p102_p0 }
   0xa   :  { %112 = shalt.err (!%p109_p4)
}
   0xb   :  { %s129_s19 = smov [#allocation2]   ;;  %s113_s20 = scalar_lea.vmem %s27_s17, 16 }
   0xc   :  { %19 = dma.vmem_to_smem %s17_s14, 16, %s129_s19, [#allocation3]  }
   0xd   :  { %p114_p5 = scmp.ne.s32.totalorder %s27_s17, %s113_s20  ;;  %p118_p6 = scmp.lt.s32.totalorder %s27_s17, %s27_s17 }
   0xe   :  { %p119_p7 = scmp.lt.s32.totalorder %s113_s20, %s113_s20 }
  0x10   :  { %p120_p8 = por %p119_p7, %p118_p6 }
  0x12   :  { %p121_p9 = pnand %p120_p8, %p114_p5 }
  0x14   :  { %124 = shalt.err (!%p121_p9)
}
  0x15   :  { %s130_s0 = smov [#allocation4]  }
  0x16   :  { %29 = dma.vmem_to_smem %s27_s17, 16, %s130_s0, [#allocation5]  }
  0x17   :  { %125 = dma.done.wait [#allocation3], 16  }
  0x18   :  { %126 = vsyncadd [#allocation3], 4294967280 }
  0x19   :  { %127 = dma.done.wait [#allocation5], 16  }
  0x1a   :  { %128 = vsyncadd [#allocation5], 4294967280 }
  0x1b   :  { %38 = sfence }
  0x1c   :  { %s39_s1 = sld [smem:[#allocation2]]  ;;  %s87_s22 = sld [smem:[#allocation2 + $0x1]]  ;;  %v41_v0 = vld [vmem:[%s183_s2] sm:$0x3]  ;;  %v46_v1 = vlaneseq  ;;  %v89_v2 = vld [vmem:[%s183_s2 + $0x2] sm:$0x3] }
  0x1d   :  { %s40_s21 = sld [smem:[#allocation4]]  ;;  %s88_s23 = sld [smem:[#allocation4 + $0x1]]  ;;  %v93_v5 = vld [vmem:[%s183_s2 + $0x4] sm:$0x3]  ;;  %v97_v9 = vld [vmem:[%s183_s2 + $0x6] sm:$0x3] }
  0x1e   :  { %s91_s24 = sld [smem:[#allocation2 + $0x2]]  ;;  %s95_s26 = sld [smem:[#allocation2 + $0x3]]  ;;  %vm48_vm0 = vcmp.lt.s32.totalorder %v46_v1, 256 }
  0x1f   :  { %s92_s25 = sld [smem:[#allocation4 + $0x2]]  ;;  %s96_s27 = sld [smem:[#allocation4 + $0x3]] }
  0x22   :  { %v42_v3 = vstv %s39_s1  ;;  %v55_v7 = vstv %s87_s22 }
  0x23   :  { %v44_v4 = vstv %s40_s21  ;;  %v43_v6 = vsub.f32 %v41_v0, %v42_v3  ;;  %v57_v8 = vstv %s88_s23  ;;  %v56_v10 = vsub.f32 %v89_v2, %v55_v7 }
  0x24   :  { %v65_v11 = vstv %s91_s24  ;;  %v75_v15 = vstv %s95_s26 }
  0x25   :  { %v67_v12 = vstv %s92_s25  ;;  %v45_v13 = vmul.f32 %v44_v4, %v43_v6  ;;  %v66_v14 = vsub.f32 %v93_v5, %v65_v11  ;;  %v77_v16 = vstv %s96_s27 }
  0x26   :  { %v58_v17 = vmul.f32 %v57_v8, %v56_v10  ;;  %v76_v18 = vsub.f32 %v97_v9, %v75_v15 }
  0x27   :  { %50 = vst.msk [vmem:[%s184_s3] sm:$0x3] %vm48_vm0, %v45_v13  ;;  %v68_v19 = vmul.f32 %v67_v12, %v66_v14 }
  0x28   :  { %90 = vst.msk [vmem:[%s184_s3 + $0x2] sm:$0x3] %vm48_vm0, %v58_v17  ;;  %v78_v20 = vmul.f32 %v77_v16, %v76_v18 }
  0x29   :  { %94 = vst.msk [vmem:[%s184_s3 + $0x4] sm:$0x3] %vm48_vm0, %v68_v19 }
  0x2a   :  { %98 = vst.msk [vmem:[%s184_s3 + $0x6] sm:$0x3] %vm48_vm0, %v78_v20 }
  0x2b   :  { %85 = vsyncpa [#allocation3], 1 }
  0x2c   :  { %86 = vsyncpa [#allocation5], 1 }

</bundles_post_ra>
